<compile_context>
chip_gen: v5e
topology: v5e:2x2
jax: 0.10.0
libtpu: 0.0.40
codegen_flags: <defaults>
</compile_context>

<pallas_src>
import jax
import jax.numpy as jnp
from jax.experimental import pallas as pl
from jax.experimental.pallas import tpu as pltpu


def _round_up(x, m):
    return ((x + m - 1) // m) * m


def _linear_relu_kernel(x_ref, wt_ref, b_ref, o_ref):
    # x_ref  : (TILE_N, D) compute-dtype tile of the embedding (streamed)
    # wt_ref : (D, D)      compute-dtype weight, already (in_features, out_features) - resident
    # b_ref  : (1, D)      f32 bias - resident
    # o_ref  : (TILE_N, D) output tile
    y = jnp.dot(x_ref[...], wt_ref[...], preferred_element_type=jnp.float32)
    y = y + b_ref[...]
    o_ref[...] = jnp.maximum(y, 0.0).astype(o_ref.dtype)


def _linear_relu_pallas(x, w, b, *, tile_n=2048, out_dtype=jnp.float32):
    """out = relu(x @ w.T + b), rows of x streamed in (tile_n, D) tiles.

    x is expected to already be in the compute dtype (bf16 recommended).
    w is PyTorch-layout (out_features, in_features); transposed once here.
    """
    N, D = x.shape
    compute_dtype = x.dtype
    in_elt = jnp.dtype(compute_dtype).itemsize
    out_elt = jnp.dtype(out_dtype).itemsize

    # ---- tile_n selection -------------------------------------------------
    # 8-aligned, clamped to the (rounded-up) batch; keep >= 2 grid steps when
    # N is large enough so both v7x TensorCores get work.
    tile_n = max(8, min(int(tile_n), _round_up(N, 8)))
    if N >= 1024 and pl.cdiv(N, tile_n) < 2:
        tile_n = max(8, _round_up(pl.cdiv(N, 2), 8))
    tile_n = _round_up(tile_n, 8)
    grid_n = pl.cdiv(N, tile_n)

    # One-time weight transpose / bias reshape (negligible for a DxD matrix).
    wt = w.T.astype(compute_dtype)               # (in_features, out_features)
    b2 = b.reshape(1, D).astype(jnp.float32)

    # VMEM budget: double-buffered x/out tiles + resident W/b (2x for safety),
    # clamped well under v7x's 64 MiB physical VMEM per TensorCore.
    vmem_bytes = (2 * tile_n * D * in_elt        # x tiles (2 bufs)
                  + 2 * tile_n * D * out_elt     # out tiles (2 bufs)
                  + 2 * D * D * in_elt           # weight
                  + 2 * D * 4)                   # bias
    vmem_limit = int(min(max(2 * vmem_bytes, 4 << 20), 48 << 20))

    cost = pl.CostEstimate(
        flops=2 * N * D * D,
        transcendentals=0,
        bytes_accessed=N * D * in_elt + D * D * in_elt + D * 4 + N * D * out_elt,
    )

    # TODO(synk): try pltpu.CORE_PARALLEL on the N axis for v7x once grid >= 2;
    # plain "parallel" already allows megacore sharding.
    return pl.pallas_call(
        _linear_relu_kernel,
        out_shape=jax.ShapeDtypeStruct((N, D), out_dtype),
        grid_spec=pltpu.PrefetchScalarGridSpec(
            num_scalar_prefetch=0,
            grid=(grid_n,),
            in_specs=[
                pl.BlockSpec((tile_n, D), lambda i: (i, 0)),   # x: streamed tiles (last one masked)
                pl.BlockSpec((D, D), lambda i: (0, 0)),        # W^T: resident
                pl.BlockSpec((1, D), lambda i: (0, 0)),        # b:   resident
            ],
            out_specs=pl.BlockSpec((tile_n, D), lambda i: (i, 0)),
        ),
        compiler_params=pltpu.CompilerParams(
            dimension_semantics=("parallel",),
            vmem_limit_bytes=vmem_limit,
        ),
        cost_estimate=cost,
    )(x, wt, b2)


def cmp_combiner_forward(embedding1, w, b, nodes_u, nodes_i, *,
                         tile_n=2048, compute_dtype=jnp.bfloat16,
                         out_dtype=jnp.float32,
                         min_pallas_elements=1 << 18, force_pallas=False):
    """embedding1: callable (nodes_u, nodes_i) -> (N, D) array.
       w: (D, D) PyTorch-style Linear weight (out_features, in_features).
       b: (D,)   Linear bias.
    """
    # TODO(synk): when embedding1 is a plain table lookup, fuse the row-gather
    # into the kernel (PrefetchScalarGridSpec + pl.Element) to cut HBM traffic;
    # kept as JAX glue here because embedding1 is an arbitrary callable.
    emb = embedding1(nodes_u, nodes_i)          # (N, D)
    N, D = emb.shape

    if not force_pallas and N * D < min_pallas_elements:
        # Tiny problems: XLA fusion of gather+matmul+bias+relu beats Pallas
        # launch + per-step DMA overhead; stay exact f32.
        x32 = emb.astype(jnp.float32)
        return jnp.maximum(x32 @ w.T.astype(jnp.float32) + b.astype(jnp.float32), 0.0)

    # Downcast at the producer so XLA fuses it into the embedding fusion and
    # the (N, D) intermediate is written to HBM exactly once, in bf16.
    x = emb.astype(compute_dtype)
    out = _linear_relu_pallas(x, w, b, tile_n=tile_n, out_dtype=out_dtype)
    # Dropout: eval-mode (training=False) => identity.
    return out


if __name__ == "__main__":
    key = jax.random.PRNGKey(0)
    k_u, k_i, k_w, k_b, k_nu, k_ni = jax.random.split(key, 6)

    # Synthetic "embedding1": two embedding tables summed to a (N, D) embedding.
    num_users, num_items, embed_dim = 64, 96, 128
    N = 500  # deliberately not a multiple of the tile -> exercises masked last block

    user_table = jax.random.normal(k_u, (num_users, embed_dim), dtype=jnp.float32)
    item_table = jax.random.normal(k_i, (num_items, embed_dim), dtype=jnp.float32)

    def embedding1(nodes_u, nodes_i):
        return user_table[nodes_u] + item_table[nodes_i]

    w = jax.random.normal(k_w, (embed_dim, embed_dim), dtype=jnp.float32) * 0.1
    b = jax.random.normal(k_b, (embed_dim,), dtype=jnp.float32) * 0.1

    nodes_u = jax.random.randint(k_nu, (N,), 0, num_users)
    nodes_i = jax.random.randint(k_ni, (N,), 0, num_items)

    # --- Pallas path: tile_n=256 -> 2-step grid, partial (masked) last block. ---
    out = cmp_combiner_forward(embedding1, w, b, nodes_u, nodes_i,
                               tile_n=256, force_pallas=True)
    out = jax.block_until_ready(out)

    ref = jnp.maximum(embedding1(nodes_u, nodes_i) @ w.T + b, 0.0)
    assert out.shape == (N, embed_dim)
    # bf16 MXU inputs with f32 accumulation -> loose tolerance vs f32 reference.
    assert jnp.allclose(out, ref, atol=5e-2, rtol=5e-2), "pallas path mismatch"

    # --- Small-size gate: tiny batch falls back to fused XLA (exact f32). ---
    out_small = cmp_combiner_forward(embedding1, w, b, nodes_u[:8], nodes_i[:8])
    out_small = jax.block_until_ready(out_small)
    ref_small = jnp.maximum(embedding1(nodes_u[:8], nodes_i[:8]) @ w.T + b, 0.0)
    assert jnp.allclose(out_small, ref_small, atol=1e-5), "fallback mismatch"

    print("KERNEL_OK")
</pallas_src>

<mosaic_0001>
module attributes {stable_mosaic.version = 11 : i64} {
  func.func @_linear_relu_kernel(%arg0: i32, %arg1: memref<256x128xbf16, #tpu.memory_space<vmem>>, %arg2: memref<128x128xbf16, #tpu.memory_space<vmem>>, %arg3: memref<1x128xf32, #tpu.memory_space<vmem>>, %arg4: memref<256x128xf32, #tpu.memory_space<vmem>>) attributes {dimension_semantics = [#tpu.dimension_semantics<parallel>], iteration_bounds = array<i64: 2>, scalar_prefetch = 0 : i64, scratch_operands = 0 : i64, tpu.core_type = #tpu.core_type<tc>, window_params = [{transform_indices = @transform_0, window_bounds = array<i64: 256, 128>}, {pipeline_mode = #tpu.pipeline_mode<synchronous>, transform_indices = @transform_1, window_bounds = array<i64: 128, 128>}, {pipeline_mode = #tpu.pipeline_mode<synchronous>, transform_indices = @transform_2, window_bounds = array<i64: 1, 128>}, {transform_indices = @transform_3, window_bounds = array<i64: 256, 128>}]} {
    %c0 = arith.constant 0 : index
    %c0_0 = arith.constant 0 : index
    %0 = vector.load %arg1[%c0, %c0_0] : memref<256x128xbf16, #tpu.memory_space<vmem>>, vector<256x128xbf16>
    %c0_1 = arith.constant 0 : index
    %c0_2 = arith.constant 0 : index
    %1 = vector.load %arg2[%c0_1, %c0_2] : memref<128x128xbf16, #tpu.memory_space<vmem>>, vector<128x128xbf16>
    %cst = arith.constant dense<0.000000e+00> : vector<256x128xf32>
    %2 = tpu.matmul %0, %1, %cst {dimension_numbers = #tpu.dot_dimension_numbers<[1], [0], [0], [1], [0, 0, 1, 1], [], []>} : vector<256x128xbf16>, vector<128x128xbf16>, vector<256x128xf32> -> vector<256x128xf32>
    %c0_3 = arith.constant 0 : index
    %c0_4 = arith.constant 0 : index
    %3 = vector.load %arg3[%c0_3, %c0_4] : memref<1x128xf32, #tpu.memory_space<vmem>>, vector<1x128xf32>
    %4 = vector.broadcast %3 : vector<1x128xf32> to vector<256x128xf32>
    %5 = arith.addf %2, %4 : vector<256x128xf32>
    %cst_5 = arith.constant 0.000000e+00 : f32
    %6 = vector.broadcast %cst_5 : f32 to vector<256x128xf32>
    %7 = arith.maximumf %5, %6 : vector<256x128xf32>
    %c0_6 = arith.constant 0 : index
    %c0_7 = arith.constant 0 : index
    %8 = vector.load %arg4[%c0_6, %c0_7] : memref<256x128xf32, #tpu.memory_space<vmem>>, vector<256x128xf32>
    tpu.vector_store %arg4[%c0_6, %c0_7], %7 {strides = array<i32>} : memref<256x128xf32, #tpu.memory_space<vmem>>, vector<256x128xf32>,
    return
  }
  func.func @transform_0(%arg0: i32) -> (i32, i32) {
    %c0_i32 = arith.constant 0 : i32
    %c0_i32_0 = arith.constant 0 : i32
    return %arg0, %c0_i32 : i32, i32
  }
  func.func @transform_1(%arg0: i32) -> (i32, i32) {
    %c0_i32 = arith.constant 0 : i32
    %c0_i32_0 = arith.constant 0 : i32
    %c0_i32_1 = arith.constant 0 : i32
    return %c0_i32, %c0_i32_0 : i32, i32
  }
  func.func @transform_2(%arg0: i32) -> (i32, i32) {
    %c0_i32 = arith.constant 0 : i32
    %c0_i32_0 = arith.constant 0 : i32
    %c0_i32_1 = arith.constant 0 : i32
    return %c0_i32, %c0_i32_0 : i32, i32
  }
  func.func @transform_3(%arg0: i32) -> (i32, i32) {
    %c0_i32 = arith.constant 0 : i32
    %c0_i32_0 = arith.constant 0 : i32
    return %arg0, %c0_i32 : i32, i32
  }
}

</mosaic_0001>

<bundles_post_ra>
// kernel: tpu_custom_call.1
= control target key start
LH: loop header
LB: loop body
LE: loop exit
PB: predicated region body
PF: predicated region fallthrough
CT: control target
= control target key end

     0   :  { %8 = vsyncpa [#allocation3], 0  ;;  %s1377_s0 = inlined_call_operand.hbm [shape: bf16[500,128], index: 0, kind: input, shape index: {}]   ;;  %s1378_s1 = inlined_call_operand.hbm [shape: bf16[128,128], index: 1, kind: input, shape index: {}]   ;;  %s1379_s2 = inlined_call_operand.vmem [shape: f32[1,128], index: 2, kind: input, shape index: {}]   ;;  %s1380_s3 = inlined_call_operand.hbm [shape: f32[500,128], index: 3, kind: output, shape index: {}]  }
   0x1   :  { %10 = vsyncpa [#allocation3 + $0x1], 0 }
   0x2   :  { %11 = vsyncpa [#allocation6], 0 }
   0x3   :  { %12 = vsyncpa [#allocation4], 0 }
   0x4   :  { %14 = vsyncpa [#allocation4 + $0x1], 0  ;;  %s1088_s12 = smov 0   ;;  %s1090_s13 = smov 0  }
   0x5   :  { %s1092_s14 = smov 0   ;;  %s1094_s15 = smov 0  }
   0x6 LB: > { %s1109_s16 = sadd.s32 4294967295, %s1057_s15   ;;  %s680_s17 = sadd.s32 4294967294, %s1057_s15   ;;  %s1057_s15 = sphi %s1094_s15, %s1397_s15   ;;  %s1053_s14 = sphi %s1092_s14, %s1396_s14   ;;  %s1049_s13 = sphi %s1090_s13, %s1395_s13   ;;  %s1045_s12 = sphi %s1088_s12, %s1394_s12  }
   0x7   : > { %s1113_s18 = sadd.s32 1, %s1057_s15   ;;  %s27_s19 = sadd.s32 1, %s1053_s14 }
   0x8   : > { %s24_s20 = ssub.s32 %s1057_s15, %s1113_s18  ;;  %p34_p0 = scmp.ne.s32.totalorder %s1053_s14, %s1049_s13 }
   0x9   : > { %p25_p1 = scmp.eq.s32.totalorder %s24_s20, 0  ;;  %p35_p2 = scmp.eq.s32.totalorder %s1057_s15, 0 }
   0xa   : > { %p40_p3 = scmp.ne.s32.totalorder %s1049_s13, %s1045_s12  ;;  %p1382_p4 = scmp.eq.s32.totalorder %s1109_s16, 0 }
   0xb   : > { %s1125_s21 = scalar_select %p25_p1, %s1053_s14, %s27_s19  }
   0xc   : > { %p1127_p5 = por %p35_p2, %p34_p0  ;;  %p1133_p6 = por %p1382_p4, %p40_p3 }
   0xd   : > { %p106_p7 = scmp.eq.s32.totalorder %s1109_s16, 1  ;;  %p112_p8 = scmp.eq.s32.totalorder %s680_s17, 1 }
   0xe   : > { %p681_p9 = scmp.ge.s32.totalorder %s1057_s15, 1  ;;  %p119_p10 = scmp.lt.s32.totalorder %s1057_s15, 3 }
   0xf   : > { %p1140_p11 = por %p106_p7, %p34_p0  ;;  %p1144_p12 = por %p112_p8, %p40_p3 }
  0x10   : > { %p1148_p13 = pnand %p681_p9, %p119_p10  ;;  %s130_s29 = sshll.u32 %s1378_s1, 4  ;;  %s131_s29 = int_to_ptr.hbm [resolvable:$true] %s130_s29 }
  0x11   : > { %s1386_s25 = scalar_select %p1144_p12, 1, 0 }
  0x12   : > { %p856_p1 = pneg %p1148_p13  ;;  %s1059_s30 = smov [#allocation5]  }
  0x13   : > { %s132_s4 = sshll.u32 %s1059_s30, 4  ;;  %s1060_s5 = smov 64   ;;  %s133_s4 = int_to_ptr.vmem [resolvable:$true] %s132_s4 }
  0x14   : > { %p857_p0 = pnand %p856_p1, %p1382_p4  ;;  %s1061_s6 = smov 4  }
  0x15   : > { %p1381_p2 = scmp.ge.s32.totalorder %s1057_s15, 2 }
  0x16   : > { %859 = dma.hbm_to_vmem [thread:$0]  (!%p857_p0), %s131_s29, 1024, %s133_s4, [#allocation6], %s1060_s5, %s1060_s5, %s1061_s6  }
  0x17   : > { %145 = sbr.rel (%p1381_p2) target bundleno = 64 (0x40), region = 24 }
  0x1c   : > { %148 = sbr.rel (!%p1127_p5) target bundleno = 64 (0x40), region = 28  ;;  %s149_s7 = sand.u32 (%p1127_p5), 1, %s1053_s14  }
  0x1d   : > { %s685_s8 = sshll.u32 (%p1127_p5), %s1057_s15, 5  ;;  %s684_s9 = sshll.u32 (%p1127_p5), %s149_s7, 7 }
  0x1e   : > { %s155_s10 = ssub.s32 (%p1127_p5), 63, %s685_s8  ;;  %s1169_s20 = scalar_lea.sflag (%p1127_p5), [#allocation3], %s149_s7 }
  0x1f   : > { %p156_p3 = scmp.lt.s32.totalorder (%p1127_p5), %s155_s10, 32  ;;  %s153_s27 = scalar_lea.vmem (%p1127_p5), [#allocation2], %s684_s9 }
  0x21   : > { %s1399_s10 = smov (!%p156_p3, %s155_s10), 32 }
  0x22   : > { %s686_s11 = sshll.u32 %s1399_s10, 2 }
  0x23   : > { %s159_s17 = ssub.s32 128, %s686_s11 }
  0x24   : > { %s160_s19 = sshll.u32 %s159_s17, 4 }
  0x25   : > { %161 = vsyncadd %s1169_s20, %s160_s19  ;;  %p1172_p5 = scmp.ne.s32.totalorder %s686_s11, 0  ;;  %s800_s28 = sshll.u32 %s1057_s15, 7 }
  0x26   : > { %s164_s4 = scalar_lea.hbm %s1377_s0, %s800_s28  ;;  %s1180_s5 = sshll.u32 %s153_s27, 4  ;;  %s169_s5 = int_to_ptr.vmem [resolvable:$true] %s1180_s5 }
  0x27   : > { %s166_s6 = sshll.u32 %s164_s4, 4  ;;  %s690_s7 = sshll.u32 %s1399_s10, 6  ;;  %s1183_s6 = int_to_ptr.hbm [resolvable:$true] %s166_s6 }
  0x28   : > { %s937_s8 = sshra.s32 %s1183_s6, 4  ;;  %s939_s9 = sshrl.u32 %s690_s7, 4  ;;  %s938_s8 = int_to_ptr.hbm [resolvable:$true] %s937_s8 }
  0x29   : > { %s944_s11 = scalar_lea.hbm %s938_s8, %s939_s9  ;;  %s948_s27 = scalar_lea.hbm %s1377_s0, 252 }
  0x2a   : > { %p945_p7 = scmp.ne.s32.totalorder %s938_s8, %s944_s11  ;;  %p949_p10 = scmp.lt.s32.totalorder %s938_s8, %s1377_s0 }
  0x2b   : > { %p950_p1 = scmp.lt.s32.totalorder %s948_s27, %s944_s11 }
  0x2c   : > { %p946_p8 = pnand %p945_p7, %p1172_p5 }
  0x2d   : > { %p951_p0 = por %p950_p1, %p949_p10 }
  0x2e   : > { %p947_p9 = pneg %p946_p8 }
  0x30   : > { %p952_p3 = pnand %p951_p0, %p947_p9 }
  0x32   : > { %955 = shalt.err (!%p952_p3)
}
  0x33   : > { %s956_s30 = sshra.s32 %s169_s5, 4  ;;  %s1062_s17 = smov [#allocation2]   ;;  %s957_s30 = int_to_ptr.vmem [resolvable:$true] %s956_s30 }
  0x34   : > { %s963_s4 = scalar_lea.vmem %s957_s30, %s939_s9  ;;  %s967_s19 = scalar_lea.vmem %s1062_s17, 256 }
  0x35   : > { %p964_p7 = scmp.ne.s32.totalorder %s957_s30, %s963_s4  ;;  %p969_p4 = scmp.lt.s32.totalorder %s967_s19, %s963_s4 }
  0x37   : > { %p965_p8 = pnand %p964_p7, %p1172_p5 }
  0x39   : > { %p966_p2 = pneg %p965_p8 }
  0x3b   : > { %p971_p12 = pnand %p969_p4, %p966_p2 }
  0x3d   : > { %974 = shalt.err (!%p971_p12)
}
  0x3e   : > { %s1063_s8 = smov 64   ;;  %s1064_s11 = smov 4  }
  0x3f   : > { %174 = dma.hbm_to_vmem [thread:$0]  (%p1172_p5), %s1183_s6, %s690_s7, %s169_s5, %s1169_s20, %s1063_s8, %s1063_s8, %s1064_s11  }
  0x40 PF: > { %180 = sbr.rel (%p1148_p13) target bundleno = 331 (0x14b), region = 32  ;;  %s1212_s9 = sand.u32 (!%p1148_p13), 1, %s1049_s13  }
  0x41   : > { %s692_s27 = sshll.u32 (!%p1148_p13), %s1212_s9, 7  ;;  %s183_s28 = scalar_lea.sflag (!%p1148_p13), [#allocation3], %s1212_s9 }
  0x42   : > { %s1216_s29 = scalar_lea.vmem (!%p1148_p13), [#allocation2], %s692_s27 }
  0x45   : > { %1032 = dma.done.wait (%p1133_p6), %s183_s28, 2048  }
  0x46   : > { %1034 = vsyncadd (%p1133_p6), %s183_s28, 4294965248  ;;  %p1389_p4 = scmp.eq.s32.totalorder %s1109_s16, 0 }
  0x48   : > { %1036 = dma.done.wait (%p1389_p4), [#allocation6], 1024   ;;  %p1390_p12 = pmov %p1389_p4 }
  0x49   : > { %v824_v0 = vld [vmem:[#allocation5 + $0x38] sm:$0xff]  ;;  %v823_v1 = vld [vmem:[#allocation5 + $0x30] sm:$0xff]  ;;  %v822_v2 = vld [vmem:[#allocation5 + $0x28] sm:$0xff]  ;;  %s694_s10 = sshll.u32 %s1212_s9, 8  ;;  %s575_s22 = scalar_lea.sflag [#allocation4], %s1212_s9 }
  0x4a   : > { %1038 = vsyncadd (%p1390_p12), [#allocation6], 4294966272  ;;  %421 = vmatpush.bf16.msra.mxu0 %v824_v0  ;;  %826 = vmatpush.bf16.msra.mxu1 %v824_v0  ;;  %v821_v3 = vld [vmem:[#allocation5 + $0x20] sm:$0xff]  ;;  %v820_v4 = vld [vmem:[#allocation5 + $0x18] sm:$0xff]  ;;  %s1250_s20 = scalar_lea.vmem [#allocation7], %s694_s10  ;;  %s792_s5 = sshll.u32 (%p1140_p11), %s1109_s16, 5 }
  0x4b   : > { %827 = vmatpush.bf16.msra.mxu2 %v824_v0  ;;  %828 = vmatpush.bf16.msra.mxu3 %v824_v0  ;;  %v819_v5 = vld [vmem:[#allocation5 + $0x10] sm:$0xff]  ;;  %v818_v6 = vld [vmem:[#allocation5 + $0x8] sm:$0xff]  ;;  %v817_v7 = vld [vmem:[#allocation5] sm:$0xff]  ;;  %s583_s6 = ssub.s32 (%p1140_p11), 63, %s792_s5 }
  0x4c   : > { %v801_v8 = vld [vmem:[%s1216_s29] sm:$0xff]  ;;  %v802_v12 = vld [vmem:[%s1216_s29 + $0x8] sm:$0xff]  ;;  %v803_v16 = vld [vmem:[%s1216_s29 + $0x10] sm:$0xff]  ;;  %p584_p6 = scmp.lt.s32.totalorder (%p1140_p11), %s583_s6, 32 }
  0x4d   : > { %v805_v9 = vld [vmem:[%s1216_s29 + $0x20] sm:$0xff]  ;;  %v806_v13 = vld [vmem:[%s1216_s29 + $0x28] sm:$0xff]  ;;  %v807_v17 = vld [vmem:[%s1216_s29 + $0x30] sm:$0xff] }
  0x4e   : > { %422 = vmatpush.bf16.msra.mxu0 %v823_v1  ;;  %829 = vmatpush.bf16.msra.mxu1 %v823_v1  ;;  %v809_v10 = vld [vmem:[%s1216_s29 + $0x40] sm:$0xff]  ;;  %v810_v14 = vld [vmem:[%s1216_s29 + $0x48] sm:$0xff]  ;;  %v811_v18 = vld [vmem:[%s1216_s29 + $0x50] sm:$0xff] }
  0x4f   : > { %830 = vmatpush.bf16.msra.mxu2 %v823_v1  ;;  %831 = vmatpush.bf16.msra.mxu3 %v823_v1  ;;  %v813_v11 = vld [vmem:[%s1216_s29 + $0x60] sm:$0xff]  ;;  %v814_v15 = vld [vmem:[%s1216_s29 + $0x68] sm:$0xff]  ;;  %v815_v19 = vld [vmem:[%s1216_s29 + $0x70] sm:$0xff] }
  0x50   : > { %v804_v20 = vld [vmem:[%s1216_s29 + $0x18] sm:$0xff]  ;;  %v1245_v24 = vld [vmem:[%s1379_s2] ss:$0 sm:$0xff] }
  0x51   : > { %v808_v21 = vld [vmem:[%s1216_s29 + $0x38] sm:$0xff] }
  0x52   : > { %423 = vmatpush.bf16.msra.mxu0 %v822_v2  ;;  %832 = vmatpush.bf16.msra.mxu1 %v822_v2  ;;  %v812_v22 = vld [vmem:[%s1216_s29 + $0x58] sm:$0xff] }
  0x53   : > { %833 = vmatpush.bf16.msra.mxu2 %v822_v2  ;;  %834 = vmatpush.bf16.msra.mxu3 %v822_v2  ;;  %v816_v23 = vld [vmem:[%s1216_s29 + $0x78] sm:$0xff] }
  0x56   : > { %424 = vmatpush.bf16.msra.mxu0 %v821_v3  ;;  %835 = vmatpush.bf16.msra.mxu1 %v821_v3 }
  0x57   : > { %836 = vmatpush.bf16.msra.mxu2 %v821_v3  ;;  %837 = vmatpush.bf16.msra.mxu3 %v821_v3 }
  0x5a   : > { %425 = vmatpush.bf16.msra.mxu0 %v820_v4  ;;  %838 = vmatpush.bf16.msra.mxu1 %v820_v4 }
  0x5b   : > { %839 = vmatpush.bf16.msra.mxu2 %v820_v4  ;;  %840 = vmatpush.bf16.msra.mxu3 %v820_v4 }
  0x5e   : > { %426 = vmatpush.bf16.msra.mxu0 %v819_v5  ;;  %841 = vmatpush.bf16.msra.mxu1 %v819_v5 }
  0x5f   : > { %842 = vmatpush.bf16.msra.mxu2 %v819_v5  ;;  %843 = vmatpush.bf16.msra.mxu3 %v819_v5 }
  0x62   : > { %427 = vmatpush.bf16.msra.mxu0 %v818_v6  ;;  %844 = vmatpush.bf16.msra.mxu1 %v818_v6 }
  0x63   : > { %845 = vmatpush.bf16.msra.mxu2 %v818_v6  ;;  %846 = vmatpush.bf16.msra.mxu3 %v818_v6 }
  0x66   : > { %428 = vmatpush.bf16.msra.mxu0 %v817_v7  ;;  %847 = vmatpush.bf16.msra.mxu1 %v817_v7 }
  0x67   : > { %848 = vmatpush.bf16.msra.mxu2 %v817_v7  ;;  %849 = vmatpush.bf16.msra.mxu3 %v817_v7 }
  0x69   : > { %429 = vmatmul.bf16.vlgmr.msra.gmra.mxu0 %v801_v8  ;;  %449 = vmatmul.bf16.vlgmr.msra.gmra.mxu1 %v805_v9 }
  0x6a   : > { %469 = vmatmul.bf16.vlgmr.msra.gmra.mxu2 %v809_v10  ;;  %489 = vmatmul.bf16.vlgmr.msra.gmra.mxu3 %v813_v11 }
  0x79   : > { %434 = vmatmul.bf16.gmra.mxu0 %v802_v12  ;;  %454 = vmatmul.bf16.gmra.mxu1 %v806_v13 }
  0x7a   : > { %474 = vmatmul.bf16.gmra.mxu2 %v810_v14  ;;  %494 = vmatmul.bf16.gmra.mxu3 %v814_v15 }
  0x89   : > { %439 = vmatmul.bf16.gmra.mxu0 %v803_v16  ;;  %459 = vmatmul.bf16.gmra.mxu1 %v807_v17 }
  0x8a   : > { %479 = vmatmul.bf16.gmra.mxu2 %v811_v18  ;;  %499 = vmatmul.bf16.gmra.mxu3 %v815_v19 }
  0x99   : > { %444 = vmatmul.bf16.gmra.mxu0 %v804_v20  ;;  %464 = vmatmul.bf16.gmra.mxu1 %v808_v21 }
  0x9a   : > { %484 = vmatmul.bf16.gmra.mxu2 %v812_v22  ;;  %504 = vmatmul.bf16.gmra.mxu3 %v816_v23 }
  0xe6   : > { %v430_v25 = vpop.f32.mrf.mxu0  ;;  %v450_v26 = vpop.f32.mrf.mxu1 }
  0xe7   : > { %v431_v27 = vadd.f32 %v1245_v24, %v430_v25  ;;  %v451_v28 = vadd.f32 %v1245_v24, %v450_v26 }
  0xe9   : > { %v510_v29 = vmax.f32 %v431_v27, 0.0  ;;  %v518_v30 = vmax.f32 %v451_v28, 0.0 }
  0xeb   : > { %542 = vst [vmem:[%s1250_s20] sm:$0xff] %v510_v29 }
  0xec   : > { %550 = vst [vmem:[%s1250_s20 + $0x40] sm:$0xff] %v518_v30 }
  0xed   : > { %v470_v31 = vpop.f32.mrf.mxu2  ;;  %v490_v32 = vpop.f32.mrf.mxu3 }
  0xee   : > { %v471_v33 = vadd.f32 %v1245_v24, %v470_v31  ;;  %v491_v34 = vadd.f32 %v1245_v24, %v490_v32  ;;  %v432_v35 = vpop.f32.mrf.mxu0  ;;  %v452_v36 = vpop.f32.mrf.mxu1 }
  0xef   : > { %v433_v37 = vadd.f32 %v1245_v24, %v432_v35  ;;  %v453_v38 = vadd.f32 %v1245_v24, %v452_v36 }
  0xf0   : > { %v526_v39 = vmax.f32 %v471_v33, 0.0  ;;  %v534_v40 = vmax.f32 %v491_v34, 0.0 }
  0xf1   : > { %v511_v41 = vmax.f32 %v433_v37, 0.0  ;;  %v519_v42 = vmax.f32 %v453_v38, 0.0 }
  0xf2   : > { %558 = vst [vmem:[%s1250_s20 + $0x80] sm:$0xff] %v526_v39 }
  0xf3   : > { %566 = vst [vmem:[%s1250_s20 + $0xc0] sm:$0xff] %v534_v40 }
  0xf4   : > { %543 = vst [vmem:[%s1250_s20 + $0x8] sm:$0xff] %v511_v41 }
  0xf5   : > { %551 = vst [vmem:[%s1250_s20 + $0x48] sm:$0xff] %v519_v42  ;;  %v472_v43 = vpop.f32.mrf.mxu2  ;;  %v492_v44 = vpop.f32.mrf.mxu3 }
  0xf6   : > { %v473_v45 = vadd.f32 %v1245_v24, %v472_v43  ;;  %v493_v46 = vadd.f32 %v1245_v24, %v492_v44  ;;  %v435_v47 = vpop.f32.mrf.mxu0  ;;  %v455_v48 = vpop.f32.mrf.mxu1 }
  0xf7   : > { %v436_v49 = vadd.f32 %v1245_v24, %v435_v47  ;;  %v456_v50 = vadd.f32 %v1245_v24, %v455_v48 }
  0xf8   : > { %v527_v51 = vmax.f32 %v473_v45, 0.0  ;;  %v535_v52 = vmax.f32 %v493_v46, 0.0 }
  0xf9   : > { %v512_v53 = vmax.f32 %v436_v49, 0.0  ;;  %v520_v54 = vmax.f32 %v456_v50, 0.0 }
  0xfa   : > { %559 = vst [vmem:[%s1250_s20 + $0x88] sm:$0xff] %v527_v51 }
  0xfb   : > { %567 = vst [vmem:[%s1250_s20 + $0xc8] sm:$0xff] %v535_v52 }
  0xfc   : > { %544 = vst [vmem:[%s1250_s20 + $0x10] sm:$0xff] %v512_v53 }
  0xfd   : > { %552 = vst [vmem:[%s1250_s20 + $0x50] sm:$0xff] %v520_v54  ;;  %v475_v55 = vpop.f32.mrf.mxu2  ;;  %v495_v56 = vpop.f32.mrf.mxu3 }
  0xfe   : > { %v476_v57 = vadd.f32 %v1245_v24, %v475_v55  ;;  %v496_v58 = vadd.f32 %v1245_v24, %v495_v56  ;;  %v437_v59 = vpop.f32.mrf.mxu0  ;;  %v457_v60 = vpop.f32.mrf.mxu1 }
  0xff   : > { %v438_v61 = vadd.f32 %v1245_v24, %v437_v59  ;;  %v458_v62 = vadd.f32 %v1245_v24, %v457_v60 }
 0x100   : > { %v528_v63 = vmax.f32 %v476_v57, 0.0  ;;  %v536_v0 = vmax.f32 %v496_v58, 0.0 }
 0x101   : > { %v513_v1 = vmax.f32 %v438_v61, 0.0  ;;  %v521_v2 = vmax.f32 %v458_v62, 0.0 }
 0x102   : > { %560 = vst [vmem:[%s1250_s20 + $0x90] sm:$0xff] %v528_v63 }
 0x103   : > { %568 = vst [vmem:[%s1250_s20 + $0xd0] sm:$0xff] %v536_v0 }
 0x104   : > { %545 = vst [vmem:[%s1250_s20 + $0x18] sm:$0xff] %v513_v1 }
 0x105   : > { %553 = vst [vmem:[%s1250_s20 + $0x58] sm:$0xff] %v521_v2  ;;  %v477_v3 = vpop.f32.mrf.mxu2  ;;  %v497_v4 = vpop.f32.mrf.mxu3 }
 0x106   : > { %v478_v5 = vadd.f32 %v1245_v24, %v477_v3  ;;  %v498_v6 = vadd.f32 %v1245_v24, %v497_v4  ;;  %v440_v7 = vpop.f32.mrf.mxu0  ;;  %v460_v8 = vpop.f32.mrf.mxu1 }
 0x107   : > { %v441_v9 = vadd.f32 %v1245_v24, %v440_v7  ;;  %v461_v10 = vadd.f32 %v1245_v24, %v460_v8 }
 0x108   : > { %v529_v11 = vmax.f32 %v478_v5, 0.0  ;;  %v537_v12 = vmax.f32 %v498_v6, 0.0 }
 0x109   : > { %v514_v13 = vmax.f32 %v441_v9, 0.0  ;;  %v522_v14 = vmax.f32 %v461_v10, 0.0 }
 0x10a   : > { %561 = vst [vmem:[%s1250_s20 + $0x98] sm:$0xff] %v529_v11 }
 0x10b   : > { %569 = vst [vmem:[%s1250_s20 + $0xd8] sm:$0xff] %v537_v12 }
 0x10c   : > { %546 = vst [vmem:[%s1250_s20 + $0x20] sm:$0xff] %v514_v13 }
 0x10d   : > { %554 = vst [vmem:[%s1250_s20 + $0x60] sm:$0xff] %v522_v14  ;;  %v480_v15 = vpop.f32.mrf.mxu2  ;;  %v500_v16 = vpop.f32.mrf.mxu3 }
 0x10e   : > { %v481_v17 = vadd.f32 %v1245_v24, %v480_v15  ;;  %v501_v18 = vadd.f32 %v1245_v24, %v500_v16  ;;  %v442_v19 = vpop.f32.mrf.mxu0  ;;  %v462_v20 = vpop.f32.mrf.mxu1 }
 0x10f   : > { %v443_v21 = vadd.f32 %v1245_v24, %v442_v19  ;;  %v463_v22 = vadd.f32 %v1245_v24, %v462_v20 }
 0x110   : > { %v530_v23 = vmax.f32 %v481_v17, 0.0  ;;  %v538_v25 = vmax.f32 %v501_v18, 0.0 }
 0x111   : > { %v515_v26 = vmax.f32 %v443_v21, 0.0  ;;  %v523_v27 = vmax.f32 %v463_v22, 0.0 }
 0x112   : > { %562 = vst [vmem:[%s1250_s20 + $0xa0] sm:$0xff] %v530_v23 }
 0x113   : > { %570 = vst [vmem:[%s1250_s20 + $0xe0] sm:$0xff] %v538_v25 }
 0x114   : > { %547 = vst [vmem:[%s1250_s20 + $0x28] sm:$0xff] %v515_v26 }
 0x115   : > { %555 = vst [vmem:[%s1250_s20 + $0x68] sm:$0xff] %v523_v27  ;;  %v482_v28 = vpop.f32.mrf.mxu2  ;;  %v502_v29 = vpop.f32.mrf.mxu3 }
 0x116   : > { %v483_v30 = vadd.f32 %v1245_v24, %v482_v28  ;;  %v503_v31 = vadd.f32 %v1245_v24, %v502_v29  ;;  %v445_v32 = vpop.f32.mrf.mxu0  ;;  %v465_v33 = vpop.f32.mrf.mxu1 }
 0x117   : > { %v446_v34 = vadd.f32 %v1245_v24, %v445_v32  ;;  %v466_v35 = vadd.f32 %v1245_v24, %v465_v33 }
 0x118   : > { %v531_v36 = vmax.f32 %v483_v30, 0.0  ;;  %v539_v37 = vmax.f32 %v503_v31, 0.0 }
 0x119   : > { %v516_v38 = vmax.f32 %v446_v34, 0.0  ;;  %v524_v39 = vmax.f32 %v466_v35, 0.0 }
 0x11a   : > { %563 = vst [vmem:[%s1250_s20 + $0xa8] sm:$0xff] %v531_v36 }
 0x11b   : > { %571 = vst [vmem:[%s1250_s20 + $0xe8] sm:$0xff] %v539_v37 }
 0x11c   : > { %548 = vst [vmem:[%s1250_s20 + $0x30] sm:$0xff] %v516_v38 }
 0x11d   : > { %556 = vst [vmem:[%s1250_s20 + $0x70] sm:$0xff] %v524_v39  ;;  %v485_v40 = vpop.f32.mrf.mxu2  ;;  %v505_v41 = vpop.f32.mrf.mxu3 }
 0x11e   : > { %v486_v42 = vadd.f32 %v1245_v24, %v485_v40  ;;  %v506_v43 = vadd.f32 %v1245_v24, %v505_v41  ;;  %v447_v44 = vpop.f32.mrf.mxu0  ;;  %v467_v45 = vpop.f32.mrf.mxu1 }
 0x11f   : > { %v448_v46 = vadd.f32 %v1245_v24, %v447_v44  ;;  %v468_v47 = vadd.f32 %v1245_v24, %v467_v45 }
 0x120   : > { %v532_v48 = vmax.f32 %v486_v42, 0.0  ;;  %v540_v49 = vmax.f32 %v506_v43, 0.0 }
 0x121   : > { %v517_v50 = vmax.f32 %v448_v46, 0.0  ;;  %v525_v51 = vmax.f32 %v468_v47, 0.0 }
 0x122   : > { %564 = vst [vmem:[%s1250_s20 + $0xb0] sm:$0xff] %v532_v48 }
 0x123   : > { %572 = vst [vmem:[%s1250_s20 + $0xf0] sm:$0xff] %v540_v49 }
 0x124   : > { %549 = vst [vmem:[%s1250_s20 + $0x38] sm:$0xff] %v517_v50 }
 0x125   : > { %557 = vst [vmem:[%s1250_s20 + $0x78] sm:$0xff] %v525_v51  ;;  %v487_v52 = vpop.f32.mrf.mxu2  ;;  %v507_v53 = vpop.f32.mrf.mxu3 }
 0x126   : > { %v488_v54 = vadd.f32 %v1245_v24, %v487_v52  ;;  %v508_v55 = vadd.f32 %v1245_v24, %v507_v53 }
 0x127   : > { %581 = sbr.rel (!%p1140_p11) target bundleno = 331 (0x14b), region = 44 }
 0x128   : > { %v533_v56 = vmax.f32 %v488_v54, 0.0  ;;  %v541_v57 = vmax.f32 %v508_v55, 0.0 }
 0x12a   : > { %565 = vst [vmem:[%s1250_s20 + $0xb8] sm:$0xff] %v533_v56 }
 0x12b   : > { %573 = vst [vmem:[%s1250_s20 + $0xf8] sm:$0xff] %v541_v57 }
 0x12c   : > { %s1401_s6 = smov (!%p584_p6, %s583_s6), 32 }
 0x12d   : > { %s793_s7 = sshll.u32 %s1401_s6, 3 }
 0x12e   : > { %s587_s30 = ssub.s32 256, %s793_s7 }
 0x12f   : > { %s588_s4 = sshll.u32 %s587_s30, 4 }
 0x130   : > { %589 = vsyncadd %s575_s22, %s588_s4  ;;  %p1323_p13 = scmp.ne.s32.totalorder %s793_s7, 0  ;;  %s825_s17 = sshll.u32 %s1109_s16, 8 }
 0x131   : > { %s592_s11 = scalar_lea.hbm %s1380_s3, %s825_s17  ;;  %s594_s27 = sshll.u32 %s1250_s20, 4  ;;  %s1332_s27 = int_to_ptr.vmem [resolvable:$true] %s594_s27 }
 0x132   : > { %s596_s28 = sshll.u32 %s592_s11, 4  ;;  %s797_s29 = sshll.u32 %s1401_s6, 7  ;;  %s1334_s28 = int_to_ptr.hbm [resolvable:$true] %s596_s28 }
 0x133   : > { %s976_s23 = sshra.s32 %s1332_s27, 4  ;;  %s978_s26 = sshrl.u32 %s797_s29, 4  ;;  %s977_s23 = int_to_ptr.vmem [resolvable:$true] %s976_s23 }
 0x134   : > { %s983_s10 = scalar_lea.vmem %s977_s23, %s978_s26  ;;  %s1065_s16 = smov [#allocation7]  }
 0x135   : > { %p984_p11 = scmp.ne.s32.totalorder %s977_s23, %s983_s10  ;;  %s987_s5 = scalar_lea.vmem %s1065_s16, 512 }
 0x136   : > { %p989_p9 = scmp.lt.s32.totalorder %s987_s5, %s983_s10 }
 0x137   : > { %p985_p2 = pnand %p984_p11, %p1323_p13 }
 0x139   : > { %p986_p5 = pneg %p985_p2 }
 0x13b   : > { %p991_p10 = pnand %p989_p9, %p986_p5 }
 0x13d   : > { %994 = shalt.err (!%p991_p10)
}
 0x13e   : > { %s995_s20 = sshra.s32 %s1334_s28, 4  ;;  %s1006_s17 = scalar_lea.hbm %s1380_s3, 504  ;;  %s996_s20 = int_to_ptr.hbm [resolvable:$true] %s995_s20 }
 0x13f   : > { %s1002_s7 = scalar_lea.hbm %s996_s20, %s978_s26  ;;  %p1007_p7 = scmp.lt.s32.totalorder %s996_s20, %s1380_s3 }
 0x140   : > { %p1003_p1 = scmp.ne.s32.totalorder %s996_s20, %s1002_s7  ;;  %p1008_p8 = scmp.lt.s32.totalorder %s1006_s17, %s1002_s7 }
 0x142   : > { %p1004_p0 = pnand %p1003_p1, %p1323_p13  ;;  %p1009_p4 = por %p1008_p8, %p1007_p7 }
 0x144   : > { %p1005_p3 = pneg %p1004_p0 }
 0x146   : > { %p1010_p12 = pnand %p1009_p4, %p1005_p3 }
 0x148   : > { %1013 = shalt.err (!%p1010_p12)
}
 0x149   : > { %s1066_s11 = smov 128   ;;  %s1067_s23 = smov 8  }
 0x14a   : > { %602 = dma.vmem_to_hbm [thread:$0]  (%p1323_p13), %s1332_s27, %s797_s29, %s1334_s28, %s575_s22, %s1066_s11, %s1066_s11, %s1067_s23  }
 0x14b PF: > { %s611_s26 = sand.u32 1, %s1045_s12   ;;  %p1392_p6 = scmp.ne.s32.totalorder %s1386_s25, 0 }
 0x14c   : > { %p1393_p11 = scmp.ge.s32.totalorder %s1057_s15, 2  ;;  %s612_s10 = scalar_lea.sflag [#allocation4], %s611_s26 }
 0x14e   : > { %p861_p2 = pnand %p1393_p11, %p1392_p6 }
 0x150   : > { %p862_p5 = pneg %p861_p2 }
 0x152   : > { %1040 = dma.done.wait (%p862_p5), %s612_s10, 4096  }
 0x153   : > { %1042 = vsyncadd (%p862_p5), %s612_s10, 4294963200  ;;  %p17_p9 = scmp.ge.s32.totalorder %s1113_s18, 4   ;;  %s1394_s12 = smov %s1049_s13 }
 0x154   : > { %s1395_s13 = smov %s1053_s14  ;;  %s1396_s14 = smov %s1125_s21 }
 0x155   : > { %s1397_s15 = smov %s1113_s18  ;;  %19 = sbr.rel (!%p17_p9) target bundleno = 6 (0x6), region = 81 }
 0x15a   :  { %618 = vsyncpa [#allocation3], 1 }
 0x15b   :  { %620 = vsyncpa [#allocation3 + $0x1], 1 }
 0x15c   :  { %621 = vsyncpa [#allocation6], 1 }
 0x15d   :  { %622 = vsyncpa [#allocation4], 1 }
 0x15e   :  { %624 = vsyncpa [#allocation4 + $0x1], 1 }

</bundles_post_ra>
